<compile_context>
chip_gen: v7x
topology: tpu7x:2x2x1
jax: 0.10.0
libtpu: 0.0.40
codegen_flags: <defaults>
</compile_context>

<pallas_src>
import jax
import jax.numpy as jnp
from jax.experimental import pallas as pl
from jax.experimental.pallas import tpu as pltpu  # noqa: F401  (TPU backend assumed)


# ---------------------------------------------------------------------------
# Fused decoder kernel: embedding -> L x LSTM cell -> Linear, all in VMEM.
# ---------------------------------------------------------------------------
def decoder_kernel(*refs):
    # inputs : tok, emb, hidden, cell, w_cat_0..w_cat_{L-1}, b_all, fc_w, fc_b
    # outputs: pred(padded), new_hidden, new_cell
    tok_ref, emb_ref, h_ref, c_ref = refs[:4]
    L, B, H = h_ref.shape
    w_refs = refs[4:4 + L]                         # each (in_l + H, 4H)
    b_ref, fcw_ref, fcb_ref = refs[4 + L:7 + L]    # (L,1,4H), (H,Vp), (1,Vp)
    pred_ref, new_h_ref, new_c_ref = refs[7 + L:]

    # --- Embedding lookup as a one-hot matmul (vectorized, MXU-friendly). ---
    V = emb_ref.shape[0]
    tok = tok_ref[...]                                              # (B, 1) int32
    onehot = (jax.lax.broadcasted_iota(jnp.int32, (B, V), 1) == tok
              ).astype(jnp.float32)                                 # (B, V)
    x = jnp.dot(onehot, emb_ref[...], preferred_element_type=jnp.float32)  # (B, E)
    # Dropout on the embedded input is identity in eval mode.

    # --- Stacked LSTM cells (seq_len = 1), PyTorch gate order i, f, g, o. ---
    for layer in range(L):
        h_prev = h_ref[layer]                                       # (B, H)
        c_prev = c_ref[layer]                                       # (B, H)
        xh = jnp.concatenate([x, h_prev], axis=1)                   # (B, in_l + H)
        gates = (jnp.dot(xh, w_refs[layer][...],
                         preferred_element_type=jnp.float32)
                 + b_ref[layer])                                    # (B, 4H)

        sg = jax.nn.sigmoid(gates)          # full-vreg EUP pass
        tg = jnp.tanh(gates)                # full-vreg EUP pass
        i = sg[:, 0 * H:1 * H]
        f = sg[:, 1 * H:2 * H]
        g = tg[:, 2 * H:3 * H]
        o = sg[:, 3 * H:4 * H]

        c_new = f * c_prev + i * g
        h_new = o * jnp.tanh(c_new)
        new_h_ref[layer] = h_new
        new_c_ref[layer] = c_new
        x = h_new                           # inter-layer dropout: identity (eval)

    # --- Final Linear: prediction (lane-dense padded vocab). ---
    pred_ref[...] = (jnp.dot(x, fcw_ref[...],
                             preferred_element_type=jnp.float32)
                     + fcb_ref[...])


# ---------------------------------------------------------------------------
# Wrapper
# ---------------------------------------------------------------------------
def _full_spec(shape):
    # Whole-array block (no tiling); total working set is << VMEM on all chips.
    return pl.BlockSpec(shape, lambda: (0,) * len(shape))


def decoder_forward(params, token_ids, hidden, cell):
    """token_ids: (B,) int32; hidden/cell: (rnn_units, B, H) float32."""
    L, B, H = hidden.shape
    emb = params["embedding"]                     # (V, E)
    V = emb.shape[0]
    w_cats = [params[f"w_cat_{l}"] for l in range(L)]
    b_all = params["b_all"]                       # (L, 1, 4H)
    fc_w = params["fc_w_t_pad"]                   # (H, Vp)  lane-dense padded
    fc_b = params["fc_b_pad"]                     # (1, Vp)
    Vp = fc_w.shape[1]

    tok = token_ids.reshape(B, 1).astype(jnp.int32)
    inputs = (tok, emb, hidden, cell, *w_cats, b_all, fc_w, fc_b)

    out_shape = (jax.ShapeDtypeStruct((B, Vp), jnp.float32),
                 jax.ShapeDtypeStruct((L, B, H), jnp.float32),
                 jax.ShapeDtypeStruct((L, B, H), jnp.float32))

    pred_pad, new_h, new_c = pl.pallas_call(
        decoder_kernel,
        out_shape=out_shape,
        in_specs=[_full_spec(a.shape) for a in inputs],
        out_specs=(_full_spec((B, Vp)),
                   _full_spec((L, B, H)),
                   _full_spec((L, B, H))),
        # hidden -> new_hidden, cell -> new_cell: in-place state update in HBM.
        input_output_aliases={2: 1, 3: 2},
    )(*inputs)

    return pred_pad[:, :V], new_h, new_c


# ---------------------------------------------------------------------------
# Deterministic parameter init (same shapes as nn.Embedding / nn.LSTM /
# nn.Linear), pre-packed into the fused-kernel layout.
# ---------------------------------------------------------------------------
def init_params(key, output_dim, emb_dim, hidden_size, rnn_units, lane=128):
    params = {}
    k = 1.0 / (hidden_size ** 0.5)

    key, sub = jax.random.split(key)
    params["embedding"] = jax.random.normal(sub, (output_dim, emb_dim),
                                            jnp.float32) * 0.1

    biases = []
    for layer in range(rnn_units):
        in_dim = emb_dim if layer == 0 else hidden_size
        key, k1, k2, k3, k4 = jax.random.split(key, 5)
        w_ih = jax.random.uniform(k1, (4 * hidden_size, in_dim), jnp.float32, -k, k)
        w_hh = jax.random.uniform(k2, (4 * hidden_size, hidden_size), jnp.float32, -k, k)
        b_ih = jax.random.uniform(k3, (4 * hidden_size,), jnp.float32, -k, k)
        b_hh = jax.random.uniform(k4, (4 * hidden_size,), jnp.float32, -k, k)
        # Fused gate weight: [x, h] @ W_cat == x @ W_ih^T + h @ W_hh^T
        params[f"w_cat_{layer}"] = jnp.concatenate([w_ih.T, w_hh.T], axis=0)
        biases.append((b_ih + b_hh).reshape(1, 4 * hidden_size))
    params["b_all"] = jnp.stack(biases, axis=0)                   # (L, 1, 4H)

    key, k1, k2 = jax.random.split(key, 3)
    fc_w = jax.random.uniform(k1, (output_dim, hidden_size), jnp.float32, -k, k)
    fc_b = jax.random.uniform(k2, (output_dim,), jnp.float32, -k, k)
    v_pad = ((output_dim + lane - 1) // lane) * lane
    pad = v_pad - output_dim
    params["fc_w_t_pad"] = jnp.pad(fc_w.T, ((0, 0), (0, pad)))    # (H, Vp)
    params["fc_b_pad"] = jnp.pad(fc_b.reshape(1, -1), ((0, 0), (0, pad)))
    return params


if __name__ == "__main__":
    OUTPUT_DIM = 64     # vocab size
    EMB_DIM = 32
    HIDDEN = 32
    RNN_UNITS = 2
    BATCH = 8

    key = jax.random.PRNGKey(0)
    key, kp, ki, kh, kc = jax.random.split(key, 5)
    params = init_params(kp, OUTPUT_DIM, EMB_DIM, HIDDEN, RNN_UNITS)

    token_ids = jax.random.randint(ki, (BATCH,), 0, OUTPUT_DIM, dtype=jnp.int32)
    hidden = jax.random.normal(kh, (RNN_UNITS, BATCH, HIDDEN), jnp.float32)
    cell = jax.random.normal(kc, (RNN_UNITS, BATCH, HIDDEN), jnp.float32)

    pred, new_hidden, new_cell = jax.jit(decoder_forward)(params, token_ids,
                                                          hidden, cell)
    jax.block_until_ready((pred, new_hidden, new_cell))

    assert pred.shape == (BATCH, OUTPUT_DIM)
    assert new_hidden.shape == (RNN_UNITS, BATCH, HIDDEN)
    assert new_cell.shape == (RNN_UNITS, BATCH, HIDDEN)
    assert bool(jnp.all(jnp.isfinite(pred)))
    assert bool(jnp.all(jnp.isfinite(new_hidden)))
    assert bool(jnp.all(jnp.isfinite(new_cell)))
    print("KERNEL_OK")
</pallas_src>

<mosaic_0001>
module attributes {stable_mosaic.version = 11 : i64} {
  func.func @decoder_kernel(%arg0: memref<8x1xi32, #tpu.memory_space<vmem>>, %arg1: memref<64x32xf32, #tpu.memory_space<vmem>>, %arg2: memref<2x8x32xf32, #tpu.memory_space<vmem>>, %arg3: memref<2x8x32xf32, #tpu.memory_space<vmem>>, %arg4: memref<64x128xf32, #tpu.memory_space<vmem>>, %arg5: memref<64x128xf32, #tpu.memory_space<vmem>>, %arg6: memref<2x1x128xf32, #tpu.memory_space<vmem>>, %arg7: memref<32x128xf32, #tpu.memory_space<vmem>>, %arg8: memref<1x128xf32, #tpu.memory_space<vmem>>, %arg9: memref<8x128xf32, #tpu.memory_space<vmem>>, %arg10: memref<2x8x32xf32, #tpu.memory_space<vmem>>, %arg11: memref<2x8x32xf32, #tpu.memory_space<vmem>>) attributes {dimension_semantics = [], scalar_prefetch = 0 : i64, scratch_operands = 0 : i64, tpu.core_type = #tpu.core_type<tc>} {
    %c0 = arith.constant 0 : index
    %c0_0 = arith.constant 0 : index
    %0 = vector.load %arg0[%c0, %c0_0] : memref<8x1xi32, #tpu.memory_space<vmem>>, vector<8x1xi32>
    %1 = tpu.iota {dimensions = array<i32: 1>} : vector<8x64xi32>
    %2 = vector.broadcast %0 : vector<8x1xi32> to vector<8x64xi32>
    %3 = arith.cmpi eq, %1, %2 : vector<8x64xi32>
    %4 = arith.extui %3 : vector<8x64xi1> to vector<8x64xi32>
    %5 = arith.sitofp %4 : vector<8x64xi32> to vector<8x64xf32>
    %c0_1 = arith.constant 0 : index
    %c0_2 = arith.constant 0 : index
    %6 = vector.load %arg1[%c0_1, %c0_2] : memref<64x32xf32, #tpu.memory_space<vmem>>, vector<64x32xf32>
    %cst = arith.constant dense<0.000000e+00> : vector<8x32xf32>
    %7 = tpu.matmul %5, %6, %cst {dimension_numbers = #tpu.dot_dimension_numbers<[1], [0], [0], [1], [0, 0, 1, 1], [], []>} : vector<8x64xf32>, vector<64x32xf32>, vector<8x32xf32> -> vector<8x32xf32>
    %c0_3 = arith.constant 0 : index
    %c0_4 = arith.constant 0 : index
    %c0_5 = arith.constant 0 : index
    %8 = vector.load %arg2[%c0_3, %c0_4, %c0_5] : memref<2x8x32xf32, #tpu.memory_space<vmem>>, vector<1x8x32xf32>
    %9 = vector.shape_cast %8 : vector<1x8x32xf32> to vector<8x32xf32>
    %c0_6 = arith.constant 0 : index
    %c0_7 = arith.constant 0 : index
    %c0_8 = arith.constant 0 : index
    %10 = vector.load %arg3[%c0_6, %c0_7, %c0_8] : memref<2x8x32xf32, #tpu.memory_space<vmem>>, vector<1x8x32xf32>
    %11 = vector.shape_cast %10 : vector<1x8x32xf32> to vector<8x32xf32>
    %12 = tpu.concatenate %7, %9 in 1 : vector<8x32xf32>, vector<8x32xf32> -> vector<8x64xf32>
    %c0_9 = arith.constant 0 : index
    %c0_10 = arith.constant 0 : index
    %13 = vector.load %arg4[%c0_9, %c0_10] : memref<64x128xf32, #tpu.memory_space<vmem>>, vector<64x128xf32>
    %cst_11 = arith.constant dense<0.000000e+00> : vector<8x128xf32>
    %14 = tpu.matmul %12, %13, %cst_11 {dimension_numbers = #tpu.dot_dimension_numbers<[1], [0], [0], [1], [0, 0, 1, 1], [], []>} : vector<8x64xf32>, vector<64x128xf32>, vector<8x128xf32> -> vector<8x128xf32>
    %c0_12 = arith.constant 0 : index
    %c0_13 = arith.constant 0 : index
    %c0_14 = arith.constant 0 : index
    %15 = vector.load %arg6[%c0_12, %c0_13, %c0_14] : memref<2x1x128xf32, #tpu.memory_space<vmem>>, vector<1x1x128xf32>
    %16 = vector.shape_cast %15 : vector<1x1x128xf32> to vector<1x128xf32>
    %17 = vector.broadcast %16 : vector<1x128xf32> to vector<8x128xf32>
    %18 = arith.addf %14, %17 : vector<8x128xf32>
    %19 = arith.negf %18 : vector<8x128xf32>
    %20 = math.exp %19 : vector<8x128xf32>
    %cst_15 = arith.constant 1.000000e+00 : f32
    %21 = vector.broadcast %cst_15 : f32 to vector<8x128xf32>
    %22 = arith.addf %21, %20 : vector<8x128xf32>
    %23 = arith.divf %21, %22 : vector<8x128xf32>
    %24 = math.tanh %18 : vector<8x128xf32>
    %25 = vector.extract_strided_slice %23 {offsets = [0, 0], sizes = [8, 32], strides = [1, 1]} : vector<8x128xf32> to vector<8x32xf32>
    %26 = vector.extract_strided_slice %23 {offsets = [0, 32], sizes = [8, 32], strides = [1, 1]} : vector<8x128xf32> to vector<8x32xf32>
    %27 = vector.extract_strided_slice %24 {offsets = [0, 64], sizes = [8, 32], strides = [1, 1]} : vector<8x128xf32> to vector<8x32xf32>
    %28 = vector.extract_strided_slice %23 {offsets = [0, 96], sizes = [8, 32], strides = [1, 1]} : vector<8x128xf32> to vector<8x32xf32>
    %29 = arith.mulf %26, %11 : vector<8x32xf32>
    %30 = arith.mulf %25, %27 : vector<8x32xf32>
    %31 = arith.addf %29, %30 : vector<8x32xf32>
    %32 = math.tanh %31 : vector<8x32xf32>
    %33 = arith.mulf %28, %32 : vector<8x32xf32>
    %c0_16 = arith.constant 0 : index
    %c0_17 = arith.constant 0 : index
    %c0_18 = arith.constant 0 : index
    %34 = vector.load %arg10[%c0_16, %c0_17, %c0_18] : memref<2x8x32xf32, #tpu.memory_space<vmem>>, vector<1x8x32xf32>
    %35 = vector.shape_cast %34 : vector<1x8x32xf32> to vector<8x32xf32>
    %36 = vector.shape_cast %33 : vector<8x32xf32> to vector<1x8x32xf32>
    tpu.vector_store %arg10[%c0_16, %c0_17, %c0_18], %36 {strides = array<i32>} : memref<2x8x32xf32, #tpu.memory_space<vmem>>, vector<1x8x32xf32>,
    %c0_19 = arith.constant 0 : index
    %c0_20 = arith.constant 0 : index
    %c0_21 = arith.constant 0 : index
    %37 = vector.load %arg11[%c0_19, %c0_20, %c0_21] : memref<2x8x32xf32, #tpu.memory_space<vmem>>, vector<1x8x32xf32>
    %38 = vector.shape_cast %37 : vector<1x8x32xf32> to vector<8x32xf32>
    %39 = vector.shape_cast %31 : vector<8x32xf32> to vector<1x8x32xf32>
    tpu.vector_store %arg11[%c0_19, %c0_20, %c0_21], %39 {strides = array<i32>} : memref<2x8x32xf32, #tpu.memory_space<vmem>>, vector<1x8x32xf32>,
    %c1 = arith.constant 1 : index
    %c0_22 = arith.constant 0 : index
    %c0_23 = arith.constant 0 : index
    %40 = vector.load %arg2[%c1, %c0_22, %c0_23] : memref<2x8x32xf32, #tpu.memory_space<vmem>>, vector<1x8x32xf32>
    %41 = vector.shape_cast %40 : vector<1x8x32xf32> to vector<8x32xf32>
    %c1_24 = arith.constant 1 : index
    %c0_25 = arith.constant 0 : index
    %c0_26 = arith.constant 0 : index
    %42 = vector.load %arg3[%c1_24, %c0_25, %c0_26] : memref<2x8x32xf32, #tpu.memory_space<vmem>>, vector<1x8x32xf32>
    %43 = vector.shape_cast %42 : vector<1x8x32xf32> to vector<8x32xf32>
    %44 = tpu.concatenate %33, %41 in 1 : vector<8x32xf32>, vector<8x32xf32> -> vector<8x64xf32>
    %c0_27 = arith.constant 0 : index
    %c0_28 = arith.constant 0 : index
    %45 = vector.load %arg5[%c0_27, %c0_28] : memref<64x128xf32, #tpu.memory_space<vmem>>, vector<64x128xf32>
    %cst_29 = arith.constant dense<0.000000e+00> : vector<8x128xf32>
    %46 = tpu.matmul %44, %45, %cst_29 {dimension_numbers = #tpu.dot_dimension_numbers<[1], [0], [0], [1], [0, 0, 1, 1], [], []>} : vector<8x64xf32>, vector<64x128xf32>, vector<8x128xf32> -> vector<8x128xf32>
    %c1_30 = arith.constant 1 : index
    %c0_31 = arith.constant 0 : index
    %c0_32 = arith.constant 0 : index
    %47 = vector.load %arg6[%c1_30, %c0_31, %c0_32] : memref<2x1x128xf32, #tpu.memory_space<vmem>>, vector<1x1x128xf32>
    %48 = vector.shape_cast %47 : vector<1x1x128xf32> to vector<1x128xf32>
    %49 = vector.broadcast %48 : vector<1x128xf32> to vector<8x128xf32>
    %50 = arith.addf %46, %49 : vector<8x128xf32>
    %51 = arith.negf %50 : vector<8x128xf32>
    %52 = math.exp %51 : vector<8x128xf32>
    %cst_33 = arith.constant 1.000000e+00 : f32
    %53 = vector.broadcast %cst_33 : f32 to vector<8x128xf32>
    %54 = arith.addf %53, %52 : vector<8x128xf32>
    %55 = arith.divf %53, %54 : vector<8x128xf32>
    %56 = math.tanh %50 : vector<8x128xf32>
    %57 = vector.extract_strided_slice %55 {offsets = [0, 0], sizes = [8, 32], strides = [1, 1]} : vector<8x128xf32> to vector<8x32xf32>
    %58 = vector.extract_strided_slice %55 {offsets = [0, 32], sizes = [8, 32], strides = [1, 1]} : vector<8x128xf32> to vector<8x32xf32>
    %59 = vector.extract_strided_slice %56 {offsets = [0, 64], sizes = [8, 32], strides = [1, 1]} : vector<8x128xf32> to vector<8x32xf32>
    %60 = vector.extract_strided_slice %55 {offsets = [0, 96], sizes = [8, 32], strides = [1, 1]} : vector<8x128xf32> to vector<8x32xf32>
    %61 = arith.mulf %58, %43 : vector<8x32xf32>
    %62 = arith.mulf %57, %59 : vector<8x32xf32>
    %63 = arith.addf %61, %62 : vector<8x32xf32>
    %64 = math.tanh %63 : vector<8x32xf32>
    %65 = arith.mulf %60, %64 : vector<8x32xf32>
    %c1_34 = arith.constant 1 : index
    %c0_35 = arith.constant 0 : index
    %c0_36 = arith.constant 0 : index
    %66 = vector.load %arg10[%c1_34, %c0_35, %c0_36] : memref<2x8x32xf32, #tpu.memory_space<vmem>>, vector<1x8x32xf32>
    %67 = vector.shape_cast %66 : vector<1x8x32xf32> to vector<8x32xf32>
    %68 = vector.shape_cast %65 : vector<8x32xf32> to vector<1x8x32xf32>
    tpu.vector_store %arg10[%c1_34, %c0_35, %c0_36], %68 {strides = array<i32>} : memref<2x8x32xf32, #tpu.memory_space<vmem>>, vector<1x8x32xf32>,
    %c1_37 = arith.constant 1 : index
    %c0_38 = arith.constant 0 : index
    %c0_39 = arith.constant 0 : index
    %69 = vector.load %arg11[%c1_37, %c0_38, %c0_39] : memref<2x8x32xf32, #tpu.memory_space<vmem>>, vector<1x8x32xf32>
    %70 = vector.shape_cast %69 : vector<1x8x32xf32> to vector<8x32xf32>
    %71 = vector.shape_cast %63 : vector<8x32xf32> to vector<1x8x32xf32>
    tpu.vector_store %arg11[%c1_37, %c0_38, %c0_39], %71 {strides = array<i32>} : memref<2x8x32xf32, #tpu.memory_space<vmem>>, vector<1x8x32xf32>,
    %c0_40 = arith.constant 0 : index
    %c0_41 = arith.constant 0 : index
    %72 = vector.load %arg7[%c0_40, %c0_41] : memref<32x128xf32, #tpu.memory_space<vmem>>, vector<32x128xf32>
    %cst_42 = arith.constant dense<0.000000e+00> : vector<8x128xf32>
    %73 = tpu.matmul %65, %72, %cst_42 {dimension_numbers = #tpu.dot_dimension_numbers<[1], [0], [0], [1], [0, 0, 1, 1], [], []>} : vector<8x32xf32>, vector<32x128xf32>, vector<8x128xf32> -> vector<8x128xf32>
    %c0_43 = arith.constant 0 : index
    %c0_44 = arith.constant 0 : index
    %74 = vector.load %arg8[%c0_43, %c0_44] : memref<1x128xf32, #tpu.memory_space<vmem>>, vector<1x128xf32>
    %75 = vector.broadcast %74 : vector<1x128xf32> to vector<8x128xf32>
    %76 = arith.addf %73, %75 : vector<8x128xf32>
    %c0_45 = arith.constant 0 : index
    %c0_46 = arith.constant 0 : index
    %77 = vector.load %arg9[%c0_45, %c0_46] : memref<8x128xf32, #tpu.memory_space<vmem>>, vector<8x128xf32>
    tpu.vector_store %arg9[%c0_45, %c0_46], %76 {strides = array<i32>} : memref<8x128xf32, #tpu.memory_space<vmem>>, vector<8x128xf32>,
    return
  }
}

</mosaic_0001>

<bundles_post_ra>
// kernel: decoder_forward.1
= control target key start
LH: loop header
LB: loop body
LE: loop exit
PB: predicated region body
PF: predicated region fallthrough
CT: control target
= control target key end

     0   :  { %17 = vsyncpa [#allocation3], 0  ;;  %s1000_s0 = inlined_call_operand.vmem [shape: s32[8,1], index: 0, kind: input, shape index: {}]   ;;  %s1001_s1 = inlined_call_operand.vmem [shape: f32[64,32], index: 1, kind: input, shape index: {}]   ;;  %s1002_s2 = inlined_call_operand.vmem [shape: f32[2,8,32], index: 2, kind: input, shape index: {}, may-alias: {2,10}]   ;;  %s1003_s3 = inlined_call_operand.vmem [shape: f32[2,8,32], index: 3, kind: input, shape index: {}, may-alias: {3,11}]   ;;  %s1004_s4 = inlined_call_operand.vmem [shape: f32[64,128], index: 4, kind: input, shape index: {}]   ;;  %s1005_s5 = inlined_call_operand.vmem [shape: f32[64,128], index: 5, kind: input, shape index: {}]   ;;  %s1006_s6 = inlined_call_operand.vmem [shape: f32[2,1,128], index: 6, kind: input, shape index: {}]   ;;  %s1007_s7 = inlined_call_operand.hbm [shape: f32[32,128], index: 7, kind: input, shape index: {}]   ;;  %s1008_s8 = inlined_call_operand.vmem [shape: f32[1,128], index: 8, kind: input, shape index: {}]   ;;  %s1009_s9 = inlined_call_operand.hbm [shape: f32[8,128], index: 9, kind: output, shape index: {0}]   ;;  %s1010_s10 = inlined_call_operand.vmem [shape: f32[2,8,32], index: 10, kind: output, shape index: {1}, may-alias: {2,10}]   ;;  %s1011_s11 = inlined_call_operand.vmem [shape: f32[2,8,32], index: 11, kind: output, shape index: {2}, may-alias: {3,11}]  }
   0x1   :  { %18 = vsyncpa [#allocation4], 0  ;;  %s753_s17 = smov [#allocation2]   ;;  %s705_s21 = scalar_lea.hbm %s1007_s7, 512 }
   0x2   :  { %s38_s18 = sshll.u32 %s753_s17, 4  ;;  %p706_p0 = scmp.ne.s32.totalorder %s1007_s7, %s705_s21  ;;  %s39_s18 = int_to_ptr.vmem [resolvable:$true] %s38_s18 }
   0x3   :  { %p709_p1 = scmp.lt.u32.totalorder %s705_s21, %s1007_s7 }
   0x5   :  { %p711_p2 = pnand %p709_p1, %p706_p0 }
   0x7   :  { %714 = shalt.err (!%p711_p2)
}
   0x8   :  { %s715_s26 = scalar_lea.vmem %s39_s18, 512  ;;  %p720_p4 = scmp.lt.s32.totalorder %s39_s18, %s39_s18 }
   0x9   :  { %p716_p3 = scmp.ne.s32.totalorder %s39_s18, %s715_s26  ;;  %p721_p5 = scmp.lt.s32.totalorder %s715_s26, %s715_s26 }
   0xb   :  { %p722_p6 = por %p721_p5, %p720_p4 }
   0xd   :  { %p723_p7 = pnand %p722_p6, %p716_p3 }
   0xf   :  { %726 = shalt.err (!%p723_p7)
}
  0x10   :  { %s754_s27 = smov 128   ;;  %s755_s28 = smov 8  }
  0x11   :  { %44 = dma.hbm_to_vmem [thread:$0]  %s1007_s7, 512, %s39_s18, [#allocation3], %s754_s27, %s754_s27, %s755_s28  }
  0x12   :  { %749 = dma.done.wait [#allocation3], 512  }
  0x13   :  { %750 = vsyncadd [#allocation3], 4294966784  ;;  %v756_v0 = vmov 0   ;;  %v757_v1 = vmov 0.0|0.0   ;;  %v50_v2 = vld [vmem:[%s1000_s0] sm:$0xff]  ;;  %v60_v4 = vld [vmem:[%s1001_s1 + $0x8] sm:$0xff]  ;;  %v51_v29 = vlaneseq }
  0x14   :  { %688 = vset.pattern.permute.xlu0 %v756_v0  ;;  %635 = vmatprep.subr.bf16.mxu0 %v757_v1  ;;  %v59_v3 = vld [vmem:[%s1001_s1] sm:$0xff]  ;;  %v61_v6 = vld [vmem:[%s1001_s1 + $0x10] sm:$0xff]  ;;  %v62_v7 = vld [vmem:[%s1001_s1 + $0x18] sm:$0xff]  ;;  %vm758_vm0 = vmmov 0   ;;  %v759_v9 = vmov 0.0   ;;  %s760_s15 = smov 32  }
  0x15   :  { %647 = vmatprep.subr.bf16.mxu1 %v757_v1  ;;  %54 = vperm.xlu0 %688, %v50_v2   ;;  %v636_v5 = vpack.c.bf16 %v60_v4, %v59_v3  ;;  %v63_v8 = vld [vmem:[%s1001_s1 + $0x20] sm:$0xff]  ;;  %v639_v10 = vpack.c.bf16 %v62_v7, %v61_v6  ;;  %v150_v13 = vld [vmem:[%s1004_s4 + $0x8] sm:$0xff]  ;;  %v151_v16 = vld [vmem:[%s1004_s4 + $0x10] sm:$0xff]  ;;  %v52_v30 = vand.u32 127, %v51_v29  ;;  %vm67_vm1 = vcmask 523264   ;;  %s761_s26 = smov 64  }
  0x16   :  { %583 = vmatprep.mubr.msk.f32.mxu0 %vm758_vm0, %v759_v9  ;;  %602 = vmatprep.mubr.msk.f32.mxu1 %vm758_vm0, %v759_v9  ;;  %v141_v11 = vld [vmem:[%s1002_s2] sm:$0xff]  ;;  %v64_v14 = vld [vmem:[%s1001_s1 + $0x28] sm:$0xff]  ;;  %v152_v17 = vld [vmem:[%s1004_s4 + $0x18] sm:$0xff]  ;;  %vm147_vm3 = vcmask 261120   ;;  %s763_s17 = smov [#allocation5]  }
  0x17   :  { %637 = vmatpush3.bf16.msra.mxu0 %v636_v5  ;;  %v149_v12 = vld [vmem:[%s1004_s4] sm:$0xff]  ;;  %v651_v18 = vpack.c.bf16 %v152_v17, %v151_v16  ;;  %v642_v19 = vpack.c.bf16 %v64_v14, %v63_v8  ;;  %v154_v21 = vld [vmem:[%s1004_s4 + $0x28] sm:$0xff]  ;;  %v65_v22 = vld [vmem:[%s1001_s1 + $0x30] sm:$0xff]  ;;  %s503_s7 = sshll.u32 %s763_s17, 4  ;;  %s504_s7 = int_to_ptr.vmem [resolvable:$true] %s503_s7 }
  0x18   :  { %638 = vmatprep.subr.bf16.mxu0 %v757_v1  ;;  %v648_v15 = vpack.c.bf16 %v150_v13, %v149_v12  ;;  %v153_v20 = vld [vmem:[%s1004_s4 + $0x20] sm:$0xff]  ;;  %v66_v23 = vld [vmem:[%s1001_s1 + $0x38] sm:$0xff]  ;;  %v155_v26 = vld [vmem:[%s1004_s4 + $0x30] sm:$0xff]  ;;  %p732_p9 = scmp.lt.s32.totalorder %s504_s7, %s504_s7 }
  0x19   :  { %144 = vrot.lane.b32.xlu0 %v141_v11, %s760_s15  ;;  %v654_v24 = vpack.c.bf16 %v154_v21, %v153_v20  ;;  %v645_v25 = vpack.c.bf16 %v66_v23, %v65_v22  ;;  %v156_v27 = vld [vmem:[%s1004_s4 + $0x38] sm:$0xff]  ;;  %v522_v37 = vld [vmem:[%s1006_s6] ss:$0 sm:$0xff]  ;;  %v285_v54 = vld [vmem:[%s1005_s5 + $0x8] sm:$0xff] }
  0x1a   :  { %649 = vmatpush3.bf16.msra.mxu1 %v648_v15  ;;  %v657_v28 = vpack.c.bf16 %v156_v27, %v155_v26  ;;  %v142_v42 = vld [vmem:[%s1003_s3] sm:$0xff]  ;;  %v286_v55 = vld [vmem:[%s1005_s5 + $0x10] sm:$0xff]  ;;  %v287_v57 = vld [vmem:[%s1005_s5 + $0x18] sm:$0xff] }
  0x1b   :  { %640 = vmatpush3.bf16.msra.mxu0 %v639_v10  ;;  %650 = vmatprep.subr.bf16.mxu1 %v757_v1  ;;  %v284_v53 = vld [vmem:[%s1005_s5] sm:$0xff]  ;;  %v663_v58 = vpack.c.bf16 %v287_v57, %v286_v55  ;;  %v289_v60 = vld [vmem:[%s1005_s5 + $0x28] sm:$0xff]  ;;  %v290_v62 = vld [vmem:[%s1005_s5 + $0x30] sm:$0xff] }
  0x1c   :  { %641 = vmatprep.subr.bf16.mxu0 %v757_v1  ;;  %v660_v56 = vpack.c.bf16 %v285_v54, %v284_v53  ;;  %v288_v59 = vld [vmem:[%s1005_s5 + $0x20] sm:$0xff]  ;;  %v291_v63 = vld [vmem:[%s1005_s5 + $0x38] sm:$0xff]  ;;  %v525_v3 = vld [vmem:[%s1002_s2 + $0x8] sm:$0xff] }
  0x1d   :  { %v666_v61 = vpack.c.bf16 %v289_v60, %v288_v59  ;;  %v669_v2 = vpack.c.bf16 %v291_v63, %v290_v62  ;;  %v526_v4 = vld [vmem:[%s1003_s3 + $0x8] sm:$0xff]  ;;  %v528_v10 = vld [vmem:[%s1006_s6 + $0x1] ss:$0 sm:$0xff]  ;;  %v415_v27 = vld [vmem:[#allocation2 + $0x10] sm:$0xff]  ;;  %s762_s3 = smov 96  }
  0x1e   :  { %652 = vmatpush3.bf16.msra.mxu1 %v651_v18  ;;  %v414_v26 = vld [vmem:[#allocation2 + $0x8] sm:$0xff]  ;;  %v416_v29 = vld [vmem:[#allocation2 + $0x18] sm:$0xff] }
  0x1f   :  { %643 = vmatpush3.bf16.msra.mxu0 %v642_v19  ;;  %653 = vmatprep.subr.bf16.mxu1 %v757_v1 }
  0x20   :  { %644 = vmatprep.subr.bf16.mxu0 %v757_v1 }
  0x22   :  { %655 = vmatpush3.bf16.msra.mxu1 %v654_v24 }
  0x23   :  { %646 = vmatpush3.bf16.msra.mxu0 %v645_v25  ;;  %656 = vmatprep.subr.bf16.mxu1 %v757_v1  ;;  %v413_v25 = vld [vmem:[#allocation2] sm:$0xff] }
  0x24   :  { %659 = vmatprep.subr.bf16.mxu0 %v757_v1 }
  0x26   :  { %658 = vmatpush3.bf16.msra.mxu1 %v657_v28  ;;  %v672_v28 = vpack.c.bf16 %v414_v26, %v413_v25 }
  0x27   :  { %671 = vmatprep.subr.bf16.mxu1 %v757_v1 }
  0x94   :  { %v55_v31 = vpop.permute.xlu0 %54 }
  0x95   :  { %vm56_vm2 = vcmp.eq.s32.totalorder %v52_v30, %v55_v31  ;;  %v675_v30 = vpack.c.bf16 %v416_v29, %v415_v27 }
  0x96   :  { %v520_v32 = vsel %vm56_vm2, 1.0, %v759_v9 }
  0x97   :  { %584 = vmatmul.mubr.msk.f32.vlgmr.msra.gmra.mrb[0].mxu0 %vm67_vm1, %v520_v32 }
  0x98   :  { %621 = vmatprep.mubr.msk.f32.mxu0 %vm758_vm0, %v759_v9  ;;  %v145_v33 = vpop.permute.xlu0 %144  ;;  %661 = vmatpush3.bf16.msra.mxu0 %v660_v56 }
  0x99   :  { %662 = vmatprep.subr.bf16.mxu0 %v757_v1 }
  0x9c   :  { %664 = vmatpush3.bf16.msra.mxu0 %v663_v58 }
  0x9d   :  { %665 = vmatprep.subr.bf16.mxu0 %v757_v1 }
  0xa0   :  { %667 = vmatpush3.bf16.msra.mxu0 %v666_v61 }
  0xa1   :  { %668 = vmatprep.subr.bf16.mxu0 %v757_v1 }
  0xa4   :  { %670 = vmatpush3.bf16.msra.mxu0 %v669_v2 }
 0x16a   :  { %v137_v34 = vpop.f32.mrb[0].mxu0 }
 0x16b   :  { %v148_v35 = vsel %vm147_vm3, %v137_v34, %v145_v33  ;;  %v585_v36 = vpop.f32.mrb[1].mxu0 }
 0x16c   :  { %603 = vmatmul.mubr.msk.f32.vlgmr.msra.gmra.mrb[0].mxu1 %vm67_vm1, %v148_v35  ;;  %v533_v36 = vld [vmem:[%s1008_s8] ss:$0 sm:$0xff] }
 0x16d   :  { %632 = vmatprep.mubr.msk.f32.mxu1 %vm758_vm0, %v759_v9  ;;  %673 = vmatpush3.bf16.msra.mxu1 %v672_v28 }
 0x16e   :  { %674 = vmatprep.subr.bf16.mxu1 %v757_v1 }
 0x171   :  { %676 = vmatpush3.bf16.msra.mxu1 %v675_v30 }
 0x23f   :  { %v233_v38 = vpop.f32.mrb[0].mxu1 }
 0x240   :  { %v234_v39 = vadd.f32 %v522_v37, %v233_v38  ;;  %v604_v40 = vpop.f32.mrb[1].mxu1 }
 0x242   :  { %689 = vtanh.f32 %v234_v39  ;;  %v524_v43 = vmul.f32 -1.442695, %v234_v39 }
 0x244   :  { %691 = vpow2.f32 %v524_v43 }
 0x24c   :  { %v690_v41 = vpop.eup %689 }
 0x24d   :  { %250 = vrot.lane.b32.xlu1 %v690_v41, %s761_s26 }
 0x24e   :  { %v692_v44 = vpop.eup %691 }
 0x24f   :  { %v240_v45 = vadd.f32 1.0, %v692_v44 }
 0x251   :  { %245 = vrot.lane.b32.xlu1 %v142_v42, %s760_s15  ;;  %693 = vrcp.f32 %v240_v45 }
 0x25b   :  { %v694_v46 = vpop.eup %693 }
 0x2bf   :  { %v251_v47 = vpop.permute.xlu1 %250 }
 0x2c0   :  { %v253_v48 = vmul.f32 %v694_v46, %v251_v47 }
 0x2c2   :  { %255 = vrot.lane.b32.xlu0 %v253_v48, %s760_s15 }
 0x2c3   :  { %v246_v49 = vpop.permute.xlu1 %245 }
 0x2c4   :  { %v248_v50 = vmul.f32 %v694_v46, %v246_v49 }
 0x334   :  { %v256_v51 = vpop.permute.xlu0 %255 }
 0x335   :  { %v917_v52 = vadd.f32 %v256_v51, %v248_v50 }
 0x337   :  { %695 = vtanh.f32 %v917_v52 }
 0x341   :  { %v696_v0 = vpop.eup %695 }
 0x342   :  { %261 = vrot.lane.b32.xlu1 %v696_v0, %s761_s26 }
 0x346   :  { %280 = vrot.lane.b32.xlu1 %v525_v3, %s760_s15 }
 0x34a   :  { %381 = vrot.lane.b32.xlu1 %v526_v4, %s760_s15 }
 0x3b4   :  { %v262_v5 = vpop.permute.xlu1 %261 }
 0x3b5   :  { %v264_v6 = vmul.f32 %v694_v46, %v262_v5 }
 0x3b7   :  { %266 = vrot.lane.b32.xlu0 %v264_v6, %s760_s15 }
 0x3b8   :  { %v281_v7 = vpop.permute.xlu1 %280 }
 0x3bc   :  { %v382_v21 = vpop.permute.xlu1 %381 }
 0x429   :  { %v267_v8 = vpop.permute.xlu0 %266 }
 0x42a   :  { %269 = vst.msk [vmem:[%s1010_s10] sm:$0xff] %vm147_vm3, %v267_v8  ;;  %v283_v9 = vsel %vm147_vm3, %v267_v8, %v281_v7 }
 0x42b   :  { %622 = vmatmul.mubr.msk.f32.vlgmr.msra.gmra.mrb[2].mxu0 %vm67_vm1, %v283_v9 }
 0x4fe   :  { %v369_v11 = vpop.f32.mrb[2].mxu0 }
 0x4ff   :  { %v370_v12 = vadd.f32 %v528_v10, %v369_v11  ;;  %v623_v13 = vpop.f32.mrb[3].mxu0 }
 0x501   :  { %697 = vtanh.f32 %v370_v12  ;;  %v530_v15 = vmul.f32 -1.442695, %v370_v12 }
 0x503   :  { %699 = vpow2.f32 %v530_v15 }
 0x50b   :  { %v698_v14 = vpop.eup %697 }
 0x50c   :  { %386 = vrot.lane.b32.xlu0 %v698_v14, %s761_s26 }
 0x50d   :  { %v700_v16 = vpop.eup %699 }
 0x50e   :  { %v376_v17 = vadd.f32 1.0, %v700_v16 }
 0x510   :  { %701 = vrcp.f32 %v376_v17 }
 0x51a   :  { %v702_v18 = vpop.eup %701 }
 0x51b   :  { %v384_v22 = vmul.f32 %v702_v18, %v382_v21 }
 0x57e   :  { %v387_v19 = vpop.permute.xlu0 %386 }
 0x57f   :  { %v389_v20 = vmul.f32 %v702_v18, %v387_v19 }
 0x581   :  { %391 = vrot.lane.b32.xlu0 %v389_v20, %s760_s15 }
 0x5f3   :  { %v392_v23 = vpop.permute.xlu0 %391 }
 0x5f4   :  { %v394_v24 = vadd.f32 %v392_v23, %v384_v22 }
 0x5f6   :  { %703 = vtanh.f32 %v394_v24 }
 0x600   :  { %v704_v31 = vpop.eup %703 }
 0x601   :  { %397 = vrot.lane.b32.xlu1 %v704_v31, %s761_s26 }
 0x605   :  { %271 = vrot.lane.b32.xlu1 %v917_v52, %s762_s3 }
 0x673   :  { %v398_v32 = vpop.permute.xlu1 %397 }
 0x674   :  { %v400_v33 = vmul.f32 %v702_v18, %v398_v32 }
 0x676   :  { %402 = vrot.lane.b32.xlu0 %v400_v33, %s760_s15 }
 0x677   :  { %v272_v34 = vpop.permute.xlu1 %271 }
 0x678   :  { %274 = vst.msk [vmem:[%s1011_s11] sm:$0xff] %vm147_vm3, %v272_v34 }
 0x67a   :  { %408 = vrot.lane.b32.xlu0 %v394_v24, %s762_s3 }
 0x6e8   :  { %v403_v35 = vpop.permute.xlu0 %402 }
 0x6e9   :  { %531 = vst.msk [vmem:[%s1010_s10 + $0x8] sm:$0xff] %vm147_vm3, %v403_v35  ;;  %633 = vmatmul.mubr.msk.f32.vlgmr.msra.gmra.mrb[2].mxu1 %vm147_vm3, %v403_v35  ;;  %s727_s10 = scalar_lea.vmem %s504_s7, 128 }
 0x6ea   :  { %p728_p8 = scmp.ne.s32.totalorder %s504_s7, %s727_s10  ;;  %p733_p10 = scmp.lt.s32.totalorder %s727_s10, %s727_s10 }
 0x6ec   :  { %v409_v1 = vpop.permute.xlu0 %408  ;;  %p734_p11 = por %p733_p10, %p732_p9 }
 0x6ed   :  { %532 = vst.msk [vmem:[%s1011_s11 + $0x8] sm:$0xff] %vm147_vm3, %v409_v1 }
 0x6ee   :  { %p735_p12 = pnand %p734_p11, %p728_p8 }
 0x7bc   :  { %v492_v37 = vpop.f32.mrb[2].mxu1 }
 0x7bd   :  { %v493_v38 = vadd.f32 %v533_v36, %v492_v37  ;;  %v634_v39 = vpop.f32.mrb[3].mxu1 }
 0x7bf   :  { %496 = vst [vmem:[#allocation5] sm:$0xff] %v493_v38 }
 0x7c0   :  { %738 = shalt.err (!%p735_p12)
}
 0x7c1   :  { %s739_s19 = scalar_lea.hbm %s1009_s9, 128 }
 0x7c2   :  { %p740_p13 = scmp.ne.s32.totalorder %s1009_s9, %s739_s19  ;;  %p743_p0 = scmp.lt.u32.totalorder %s739_s19, %s1009_s9 }
 0x7c4   :  { %p745_p1 = pnand %p743_p0, %p740_p13 }
 0x7c6   :  { %748 = shalt.err (!%p745_p1)
}
 0x7c7   :  { %506 = dma.vmem_to_hbm [thread:$0]  %s504_s7, 128, %s1009_s9, [#allocation4]  }
 0x7c8   :  { %751 = dma.done.wait [#allocation4], 128  }
 0x7c9   :  { %752 = vsyncadd [#allocation4], 4294967168 }
 0x7ca   :  { %518 = vsyncpa [#allocation3], 1 }
 0x7cb   :  { %519 = vsyncpa [#allocation4], 1 }

</bundles_post_ra>
